<compile_context>
chip_gen: v5e
topology: v5e:2x2
jax: 0.10.0
libtpu: 0.0.40
codegen_flags: <defaults>
</compile_context>

<pallas_src>
import functools

import jax
import jax.numpy as jnp
from jax import lax
from jax.experimental import pallas as pl
from jax.experimental.pallas import tpu as pltpu


def _choose_seq_tile(s_out, d, itemsize, budget_bytes, max_rows=None):
    """Pick the sequence-tile length TS and (possibly padded) output length."""
    budget_rows = max(8, budget_bytes // max(1, d * itemsize))
    if max_rows is not None:
        budget_rows = max(1, min(budget_rows, max_rows))
    if s_out <= budget_rows:
        return s_out, s_out                     # single full-extent block
    ts = max(8, (budget_rows // 8) * 8)
    t = ts
    while t >= 8:                               # prefer a multiple-of-8 divisor
        if s_out % t == 0:
            return t, s_out
        t -= 8
    s_pad = pl.cdiv(s_out, ts) * ts             # else pad; wrapper slices the tail
    return ts, s_pad


def _soft_embed_kernel(n_prefix, seq_len, vocab, seq_tile, num_tiles,
                       tok_ref, wte_hbm, learned_hbm, o_ref, stage_ref, sem_ref):
    """Grid step (b, t): emit output rows [t*TS, (t+1)*TS) of batch row b.

    tok_ref:     SMEM (B*S,) int32 -- scalar-prefetched token ids (flattened)
    wte_hbm:     HBM  (V, D)       -- embedding table (never staged wholesale)
    learned_hbm: HBM  (n_tok, D)   -- learned soft prompt
    o_ref:       VMEM (1, TS, D)   -- pipelined output block
    stage_ref:   VMEM (2, TS, D)   -- double-buffered gather staging
    sem_ref:     DMA sems (2,)     -- one shared semaphore per staging slot
    """
    b = pl.program_id(0)
    t = pl.program_id(1)
    slot = t % 2

    def issue_tile(bb, tt, ss):
        """Enqueue exactly one (1, D) row-DMA per output row of tile (bb, tt)."""
        base = tt * seq_tile
        sem = sem_ref.at[ss]

        def issue_row(r, carry):
            j = base + r                                    # output position
            dst = stage_ref.at[ss, pl.ds(r, 1), :]

            def gather_token():
                tpos = jnp.minimum(j, seq_len - 1)          # clamp padded tail rows
                # NOTE: clip guards OOB token ids (silently remaps, never faults).
                tok = jnp.clip(tok_ref[bb * seq_len + tpos], 0, vocab - 1)
                pltpu.make_async_copy(
                    wte_hbm.at[pl.ds(tok, 1), :], dst, sem).start()

            if n_prefix > 0:
                @pl.when(j < n_prefix)                      # soft-prompt row
                def _():
                    pltpu.make_async_copy(
                        learned_hbm.at[pl.ds(j, 1), :], dst, sem).start()

                pl.when(j >= n_prefix)(gather_token)
            else:
                gather_token()
            return carry

        lax.fori_loop(0, seq_tile, issue_row, 0, unroll=min(8, seq_tile))

    # Prime the current tile at the start of every batch row (keeps the
    # cross-step carry inside one batch row -> safe under megacore sharding).
    @pl.when(t == 0)
    def _():
        issue_tile(b, 0, 0)

    # Cross-tile prefetch: enqueue next tile's gathers BEFORE waiting on this one.
    if num_tiles > 1:
        @pl.when(t + 1 < num_tiles)
        def _():
            issue_tile(b, t + 1, 1 - slot)

    # Bulk wait: every row of the current tile contributed exactly one (1, D)
    # copy on sem[slot], so one (TS, D)-sized wait drains the whole tile.
    pltpu.make_async_copy(stage_ref.at[1 - slot], stage_ref.at[slot],
                          sem_ref.at[slot]).wait()

    # One aligned, full-tile store into the pipelined output block.
    o_ref[0, :, :] = stage_ref[slot]


def soft_embedding_forward(tokens, wte, learned_embedding, *,
                           block_bytes=4 << 20, max_block_rows=None):
    """Pallas implementation of SoftEmbedding.forward."""
    B, S = tokens.shape
    V, D = wte.shape
    n_tokens = learned_embedding.shape[0]
    dtype = wte.dtype
    learned_embedding = learned_embedding.astype(dtype)
    itemsize = jnp.dtype(dtype).itemsize

    use_prefix = S > 1
    n_prefix = n_tokens if use_prefix else 0
    # torch.cat([learned (n_tokens rows), wte(tokens[:, n_tokens:])], dim=1)
    s_out = (n_tokens + max(S - n_tokens, 0)) if use_prefix else S

    seq_tile, s_pad = _choose_seq_tile(s_out, D, itemsize, block_bytes, max_block_rows)
    num_tiles = s_pad // seq_tile

    # Flat 1-D int32 ids -> no 2-D SMEM sublane-padding blow-up.
    tok_flat = tokens.reshape(-1).astype(jnp.int32)

    # Degenerate learned table (n_tokens == 0): pass a 1-row dummy; the prefix
    # path is compiled out (n_prefix == 0) so it is never read.
    learned_arg = learned_embedding if n_tokens > 0 else jnp.zeros((1, D), dtype)

    kernel = functools.partial(_soft_embed_kernel, n_prefix, S, V, seq_tile, num_tiles)

    grid_spec = pltpu.PrefetchScalarGridSpec(
        num_scalar_prefetch=1,                      # token ids -> SMEM
        grid=(B, num_tiles),
        in_specs=[
            pl.BlockSpec(memory_space=pl.ANY),      # wte stays in HBM
            pl.BlockSpec(memory_space=pl.ANY),      # learned prefix stays in HBM
        ],
        out_specs=pl.BlockSpec((1, seq_tile, D), lambda b, t, tok: (b, t, 0)),
        scratch_shapes=[
            pltpu.VMEM((2, seq_tile, D), dtype),    # double-buffered staging
            pltpu.SemaphoreType.DMA((2,)),          # one shared sem per slot
        ],
    )

    tile_bytes = seq_tile * D * itemsize
    # Purely bandwidth-bound: bytes only, zero flops.
    bytes_moved = (B * s_pad * D * itemsize         # gathered rows read from HBM
                   + B * s_pad * D * itemsize       # output write
                   + B * S * 4)                     # token ids
    cost = pl.CostEstimate(flops=0, transcendentals=0, bytes_accessed=int(bytes_moved))

    # 2x pipelined output block + 2x staging slot + headroom (fits v5e..v7x).
    vmem_limit = int(min(56 << 20, max(16 << 20, 4 * tile_bytes + (2 << 20))))

    out = pl.pallas_call(
        kernel,
        grid_spec=grid_spec,
        out_shape=jax.ShapeDtypeStruct((B, s_pad, D), dtype),
        compiler_params=pltpu.CompilerParams(
            # Batch axis may shard across TensorCores (v7x); tile axis must stay
            # sequential because of the cross-tile prefetch carry.
            dimension_semantics=("parallel", "arbitrary"),
            vmem_limit_bytes=vmem_limit,
        ),
        cost_estimate=cost,
    )(tok_flat, wte, learned_arg)

    if s_pad != s_out:
        out = out[:, :s_out, :]
    return out


if __name__ == "__main__":
    key = jax.random.PRNGKey(0)
    k_wte, k_tok, k_tok2 = jax.random.split(key, 3)

    # --- Case 1: S > 1, single tile (B=2, S=8, D=128, V=64, n_tokens=4) ---
    B, S, D, V, n_tokens = 2, 8, 128, 64, 4
    wte = jax.random.normal(k_wte, (V, D), dtype=jnp.float32)
    learned = wte[:n_tokens]                      # initialize_from_vocab=True
    tokens = jax.random.randint(k_tok, (B, S), 0, V, dtype=jnp.int32)

    out = jax.block_until_ready(soft_embedding_forward(tokens, wte, learned))
    ref = jnp.concatenate(
        [jnp.broadcast_to(learned[None], (B, n_tokens, D)), wte[tokens[:, n_tokens:]]],
        axis=1)
    assert out.shape == (B, S, D), out.shape
    assert jnp.allclose(out, ref), "mismatch: S > 1, single tile"

    # --- Case 2: S == 1 (plain embedding lookup) ---
    tokens1 = tokens[:, :1]
    out1 = jax.block_until_ready(soft_embedding_forward(tokens1, wte, learned))
    assert out1.shape == (B, 1, D), out1.shape
    assert jnp.allclose(out1, wte[tokens1]), "mismatch: S == 1"

    # --- Case 3: multi-tile + prefix spanning tiles + padded tail + prefetch ---
    S3, n3 = 20, 12
    learned3 = wte[:n3]
    tokens3 = jax.random.randint(k_tok2, (B, S3), 0, V, dtype=jnp.int32)
    out3 = jax.block_until_ready(
        soft_embedding_forward(tokens3, wte, learned3, max_block_rows=8))
    ref3 = jnp.concatenate(
        [jnp.broadcast_to(learned3[None], (B, n3, D)), wte[tokens3[:, n3:]]], axis=1)
    assert out3.shape == (B, S3, D), out3.shape
    assert jnp.allclose(out3, ref3), "mismatch: multi-tile / prefetch path"

    # --- Case 4: 1 < S < n_tokens (output is just the learned prefix) ---
    tokens4 = tokens[:, :3]
    out4 = jax.block_until_ready(soft_embedding_forward(tokens4, wte, learned))
    ref4 = jnp.broadcast_to(learned[None], (B, n_tokens, D))
    assert out4.shape == (B, n_tokens, D), out4.shape
    assert jnp.allclose(out4, ref4), "mismatch: 1 < S < n_tokens"

    print("KERNEL_OK")
</pallas_src>

<mosaic_0001>
module attributes {stable_mosaic.version = 11 : i64} {
  func.func @_soft_embed_kernel(%arg0: i32, %arg1: i32, %arg2: memref<16xi32, #tpu.memory_space<smem>>, %arg3: memref<64x128xf32, #tpu.memory_space<any>>, %arg4: memref<4x128xf32, #tpu.memory_space<any>>, %arg5: memref<1x8x128xf32, #tpu.memory_space<vmem>>, %arg6: memref<2x8x128xf32, #tpu.memory_space<vmem>>, %arg7: memref<2x!tpu.dma_semaphore, #tpu.memory_space<semaphore_mem>>) attributes {dimension_semantics = [#tpu.dimension_semantics<parallel>, #tpu.dimension_semantics<arbitrary>], iteration_bounds = array<i64: 2, 1>, scalar_prefetch = 1 : i64, scratch_operands = 2 : i64, tpu.core_type = #tpu.core_type<tc>, window_params = [{}, {}, {transform_indices = @transform_2, window_bounds = array<i64: 1, 8, 128>}]} {
    %c2_i32 = arith.constant 2 : i32
    %c0_i32 = arith.constant 0 : i32
    %0 = arith.cmpi eq, %c2_i32, %c0_i32 : i32
    %c1_i32 = arith.constant 1 : i32
    %1 = arith.select %0, %c1_i32, %c2_i32 : i32
    %2 = arith.remsi %arg1, %1 : i32
    %c0_i32_0 = arith.constant 0 : i32
    %3 = arith.cmpi ne, %2, %c0_i32_0 : i32
    %c0_i32_1 = arith.constant 0 : i32
    %4 = arith.cmpi slt, %2, %c0_i32_1 : i32
    %c0_i32_2 = arith.constant 0 : i32
    %5 = arith.cmpi slt, %1, %c0_i32_2 : i32
    %6 = arith.xori %4, %5 : i1
    %7 = arith.andi %6, %3 : i1
    %8 = arith.addi %2, %1 : i32
    %9 = arith.select %7, %8, %2 : i32
    %c0_i32_3 = arith.constant 0 : i32
    %10 = arith.cmpi eq, %arg1, %c0_i32_3 : i32
    %11 = arith.extui %10 : i1 to i32
    %c0_i32_4 = arith.constant 0 : i32
    %12 = arith.cmpi ne, %11, %c0_i32_4 : i32
    scf.if %12 {
      %c0_i32_14 = arith.constant 0 : i32
      %c0_i32_15 = arith.constant 0 : i32
      %c0_i32_16 = arith.constant 0 : i32
      %26 = arith.addi %c0_i32_16, %c0_i32_15 : i32
      %c4_i32 = arith.constant 4 : i32
      %27 = arith.cmpi slt, %26, %c4_i32 : i32
      %28 = arith.extui %27 : i1 to i32
      %c0_i32_17 = arith.constant 0 : i32
      %c0_i32_18 = arith.constant 0 : i32
      %29 = arith.cmpi ne, %28, %c0_i32_18 : i32
      scf.if %29 {
        %c0_i32_74 = arith.constant 0 : i32
        %82 = tpu.memref_slice %arg4[%26, %c0_i32_74] : memref<4x128xf32, #tpu.memory_space<any>> -> memref<1x128xf32, #tpu.memory_space<any>>
        %c0_i32_75 = arith.constant 0 : i32
        %83 = tpu.memref_slice %arg6[%c0_i32_17, %c0_i32_15, %c0_i32_75] : memref<2x8x128xf32, #tpu.memory_space<vmem>> -> memref<1x1x128xf32, #tpu.memory_space<vmem>>
        %84 = tpu.memref_squeeze %83 : memref<1x1x128xf32, #tpu.memory_space<vmem>> -> memref<1x128xf32, #tpu.memory_space<vmem>>
        %85 = tpu.memref_slice %arg7[%c0_i32_14] : memref<2x!tpu.dma_semaphore, #tpu.memory_space<semaphore_mem>> -> memref<1x!tpu.dma_semaphore, #tpu.memory_space<semaphore_mem>>
        %86 = tpu.memref_squeeze %85 : memref<1x!tpu.dma_semaphore, #tpu.memory_space<semaphore_mem>> -> memref<!tpu.dma_semaphore, #tpu.memory_space<semaphore_mem>>
        tpu.enqueue_dma source(%82 : memref<1x128xf32, #tpu.memory_space<any>>) target(%84 : memref<1x128xf32, #tpu.memory_space<vmem>>) target_semaphore(%86 : memref<!tpu.dma_semaphore, #tpu.memory_space<semaphore_mem>>)
      } else {
      }
      %c4_i32_19 = arith.constant 4 : i32
      %30 = arith.cmpi sge, %26, %c4_i32_19 : i32
      %31 = arith.extui %30 : i1 to i32
      %c0_i32_20 = arith.constant 0 : i32
      %c0_i32_21 = arith.constant 0 : i32
      %32 = arith.cmpi ne, %31, %c0_i32_21 : i32
      scf.if %32 {
        %c7_i32_74 = arith.constant 7 : i32
        %82 = arith.minsi %26, %c7_i32_74 : i32
        %c8_i32_75 = arith.constant 8 : i32
        %83 = arith.muli %arg0, %c8_i32_75 : i32
        %84 = arith.addi %83, %82 : i32
        %85 = arith.index_cast %84 : i32 to index
        %86 = memref.load %arg2[%85] : memref<16xi32, #tpu.memory_space<smem>>
        %c0_i32_76 = arith.constant 0 : i32
        %c63_i32 = arith.constant 63 : i32
        %87 = arith.maxsi %c0_i32_76, %86 : i32
        %88 = arith.minsi %c63_i32, %87 : i32
        %c0_i32_77 = arith.constant 0 : i32
        %89 = tpu.memref_slice %arg3[%88, %c0_i32_77] : memref<64x128xf32, #tpu.memory_space<any>> -> memref<1x128xf32, #tpu.memory_space<any>>
        %c0_i32_78 = arith.constant 0 : i32
        %90 = tpu.memref_slice %arg6[%c0_i32_20, %c0_i32_15, %c0_i32_78] : memref<2x8x128xf32, #tpu.memory_space<vmem>> -> memref<1x1x128xf32, #tpu.memory_space<vmem>>
        %91 = tpu.memref_squeeze %90 : memref<1x1x128xf32, #tpu.memory_space<vmem>> -> memref<1x128xf32, #tpu.memory_space<vmem>>
        %92 = tpu.memref_slice %arg7[%c0_i32_14] : memref<2x!tpu.dma_semaphore, #tpu.memory_space<semaphore_mem>> -> memref<1x!tpu.dma_semaphore, #tpu.memory_space<semaphore_mem>>
        %93 = tpu.memref_squeeze %92 : memref<1x!tpu.dma_semaphore, #tpu.memory_space<semaphore_mem>> -> memref<!tpu.dma_semaphore, #tpu.memory_space<semaphore_mem>>
        tpu.enqueue_dma source(%89 : memref<1x128xf32, #tpu.memory_space<any>>) target(%91 : memref<1x128xf32, #tpu.memory_space<vmem>>) target_semaphore(%93 : memref<!tpu.dma_semaphore, #tpu.memory_space<semaphore_mem>>)
      } else {
      }
      %c1_i32_22 = arith.constant 1 : i32
      %c0_i32_23 = arith.constant 0 : i32
      %33 = arith.addi %c0_i32_23, %c1_i32_22 : i32
      %c4_i32_24 = arith.constant 4 : i32
      %34 = arith.cmpi slt, %33, %c4_i32_24 : i32
      %35 = arith.extui %34 : i1 to i32
      %c0_i32_25 = arith.constant 0 : i32
      %c0_i32_26 = arith.constant 0 : i32
      %36 = arith.cmpi ne, %35, %c0_i32_26 : i32
      scf.if %36 {
        %c0_i32_74 = arith.constant 0 : i32
        %82 = tpu.memref_slice %arg4[%33, %c0_i32_74] : memref<4x128xf32, #tpu.memory_space<any>> -> memref<1x128xf32, #tpu.memory_space<any>>
        %c0_i32_75 = arith.constant 0 : i32
        %83 = tpu.memref_slice %arg6[%c0_i32_25, %c1_i32_22, %c0_i32_75] : memref<2x8x128xf32, #tpu.memory_space<vmem>> -> memref<1x1x128xf32, #tpu.memory_space<vmem>>
        %84 = tpu.memref_squeeze %83 : memref<1x1x128xf32, #tpu.memory_space<vmem>> -> memref<1x128xf32, #tpu.memory_space<vmem>>
        %85 = tpu.memref_slice %arg7[%c0_i32_14] : memref<2x!tpu.dma_semaphore, #tpu.memory_space<semaphore_mem>> -> memref<1x!tpu.dma_semaphore, #tpu.memory_space<semaphore_mem>>
        %86 = tpu.memref_squeeze %85 : memref<1x!tpu.dma_semaphore, #tpu.memory_space<semaphore_mem>> -> memref<!tpu.dma_semaphore, #tpu.memory_space<semaphore_mem>>
        tpu.enqueue_dma source(%82 : memref<1x128xf32, #tpu.memory_space<any>>) target(%84 : memref<1x128xf32, #tpu.memory_space<vmem>>) target_semaphore(%86 : memref<!tpu.dma_semaphore, #tpu.memory_space<semaphore_mem>>)
      } else {
      }
      %c4_i32_27 = arith.constant 4 : i32
      %37 = arith.cmpi sge, %33, %c4_i32_27 : i32
      %38 = arith.extui %37 : i1 to i32
      %c0_i32_28 = arith.constant 0 : i32
      %c0_i32_29 = arith.constant 0 : i32
      %39 = arith.cmpi ne, %38, %c0_i32_29 : i32
      scf.if %39 {
        %c7_i32_74 = arith.constant 7 : i32
        %82 = arith.minsi %33, %c7_i32_74 : i32
        %c8_i32_75 = arith.constant 8 : i32
        %83 = arith.muli %arg0, %c8_i32_75 : i32
        %84 = arith.addi %83, %82 : i32
        %85 = arith.index_cast %84 : i32 to index
        %86 = memref.load %arg2[%85] : memref<16xi32, #tpu.memory_space<smem>>
        %c0_i32_76 = arith.constant 0 : i32
        %c63_i32 = arith.constant 63 : i32
        %87 = arith.maxsi %c0_i32_76, %86 : i32
        %88 = arith.minsi %c63_i32, %87 : i32
        %c0_i32_77 = arith.constant 0 : i32
        %89 = tpu.memref_slice %arg3[%88, %c0_i32_77] : memref<64x128xf32, #tpu.memory_space<any>> -> memref<1x128xf32, #tpu.memory_space<any>>
        %c0_i32_78 = arith.constant 0 : i32
        %90 = tpu.memref_slice %arg6[%c0_i32_28, %c1_i32_22, %c0_i32_78] : memref<2x8x128xf32, #tpu.memory_space<vmem>> -> memref<1x1x128xf32, #tpu.memory_space<vmem>>
        %91 = tpu.memref_squeeze %90 : memref<1x1x128xf32, #tpu.memory_space<vmem>> -> memref<1x128xf32, #tpu.memory_space<vmem>>
        %92 = tpu.memref_slice %arg7[%c0_i32_14] : memref<2x!tpu.dma_semaphore, #tpu.memory_space<semaphore_mem>> -> memref<1x!tpu.dma_semaphore, #tpu.memory_space<semaphore_mem>>
        %93 = tpu.memref_squeeze %92 : memref<1x!tpu.dma_semaphore, #tpu.memory_space<semaphore_mem>> -> memref<!tpu.dma_semaphore, #tpu.memory_space<semaphore_mem>>
        tpu.enqueue_dma source(%89 : memref<1x128xf32, #tpu.memory_space<any>>) target(%91 : memref<1x128xf32, #tpu.memory_space<vmem>>) target_semaphore(%93 : memref<!tpu.dma_semaphore, #tpu.memory_space<semaphore_mem>>)
      } else {
      }
      %c2_i32_30 = arith.constant 2 : i32
      %c0_i32_31 = arith.constant 0 : i32
      %40 = arith.addi %c0_i32_31, %c2_i32_30 : i32
      %c4_i32_32 = arith.constant 4 : i32
      %41 = arith.cmpi slt, %40, %c4_i32_32 : i32
      %42 = arith.extui %41 : i1 to i32
      %c0_i32_33 = arith.constant 0 : i32
      %c0_i32_34 = arith.constant 0 : i32
      %43 = arith.cmpi ne, %42, %c0_i32_34 : i32
      scf.if %43 {
        %c0_i32_74 = arith.constant 0 : i32
        %82 = tpu.memref_slice %arg4[%40, %c0_i32_74] : memref<4x128xf32, #tpu.memory_space<any>> -> memref<1x128xf32, #tpu.memory_space<any>>
        %c0_i32_75 = arith.constant 0 : i32
        %83 = tpu.memref_slice %arg6[%c0_i32_33, %c2_i32_30, %c0_i32_75] : memref<2x8x128xf32, #tpu.memory_space<vmem>> -> memref<1x1x128xf32, #tpu.memory_space<vmem>>
        %84 = tpu.memref_squeeze %83 : memref<1x1x128xf32, #tpu.memory_space<vmem>> -> memref<1x128xf32, #tpu.memory_space<vmem>>
        %85 = tpu.memref_slice %arg7[%c0_i32_14] : memref<2x!tpu.dma_semaphore, #tpu.memory_space<semaphore_mem>> -> memref<1x!tpu.dma_semaphore, #tpu.memory_space<semaphore_mem>>
        %86 = tpu.memref_squeeze %85 : memref<1x!tpu.dma_semaphore, #tpu.memory_space<semaphore_mem>> -> memref<!tpu.dma_semaphore, #tpu.memory_space<semaphore_mem>>
        tpu.enqueue_dma source(%82 : memref<1x128xf32, #tpu.memory_space<any>>) target(%84 : memref<1x128xf32, #tpu.memory_space<vmem>>) target_semaphore(%86 : memref<!tpu.dma_semaphore, #tpu.memory_space<semaphore_mem>>)
      } else {
      }
      %c4_i32_35 = arith.constant 4 : i32
      %44 = arith.cmpi sge, %40, %c4_i32_35 : i32
      %45 = arith.extui %44 : i1 to i32
      %c0_i32_36 = arith.constant 0 : i32
      %c0_i32_37 = arith.constant 0 : i32
      %46 = arith.cmpi ne, %45, %c0_i32_37 : i32
      scf.if %46 {
        %c7_i32_74 = arith.constant 7 : i32
        %82 = arith.minsi %40, %c7_i32_74 : i32
        %c8_i32_75 = arith.constant 8 : i32
        %83 = arith.muli %arg0, %c8_i32_75 : i32
        %84 = arith.addi %83, %82 : i32
        %85 = arith.index_cast %84 : i32 to index
        %86 = memref.load %arg2[%85] : memref<16xi32, #tpu.memory_space<smem>>
        %c0_i32_76 = arith.constant 0 : i32
        %c63_i32 = arith.constant 63 : i32
        %87 = arith.maxsi %c0_i32_76, %86 : i32
        %88 = arith.minsi %c63_i32, %87 : i32
        %c0_i32_77 = arith.constant 0 : i32
        %89 = tpu.memref_slice %arg3[%88, %c0_i32_77] : memref<64x128xf32, #tpu.memory_space<any>> -> memref<1x128xf32, #tpu.memory_space<any>>
        %c0_i32_78 = arith.constant 0 : i32
        %90 = tpu.memref_slice %arg6[%c0_i32_36, %c2_i32_30, %c0_i32_78] : memref<2x8x128xf32, #tpu.memory_space<vmem>> -> memref<1x1x128xf32, #tpu.memory_space<vmem>>
        %91 = tpu.memref_squeeze %90 : memref<1x1x128xf32, #tpu.memory_space<vmem>> -> memref<1x128xf32, #tpu.memory_space<vmem>>
        %92 = tpu.memref_slice %arg7[%c0_i32_14] : memref<2x!tpu.dma_semaphore, #tpu.memory_space<semaphore_mem>> -> memref<1x!tpu.dma_semaphore, #tpu.memory_space<semaphore_mem>>
        %93 = tpu.memref_squeeze %92 : memref<1x!tpu.dma_semaphore, #tpu.memory_space<semaphore_mem>> -> memref<!tpu.dma_semaphore, #tpu.memory_space<semaphore_mem>>
        tpu.enqueue_dma source(%89 : memref<1x128xf32, #tpu.memory_space<any>>) target(%91 : memref<1x128xf32, #tpu.memory_space<vmem>>) target_semaphore(%93 : memref<!tpu.dma_semaphore, #tpu.memory_space<semaphore_mem>>)
      } else {
      }
      %c3_i32 = arith.constant 3 : i32
      %c0_i32_38 = arith.constant 0 : i32
      %47 = arith.addi %c0_i32_38, %c3_i32 : i32
      %c4_i32_39 = arith.constant 4 : i32
      %48 = arith.cmpi slt, %47, %c4_i32_39 : i32
      %49 = arith.extui %48 : i1 to i32
      %c0_i32_40 = arith.constant 0 : i32
      %c0_i32_41 = arith.constant 0 : i32
      %50 = arith.cmpi ne, %49, %c0_i32_41 : i32
      scf.if %50 {
        %c0_i32_74 = arith.constant 0 : i32
        %82 = tpu.memref_slice %arg4[%47, %c0_i32_74] : memref<4x128xf32, #tpu.memory_space<any>> -> memref<1x128xf32, #tpu.memory_space<any>>
        %c0_i32_75 = arith.constant 0 : i32
        %83 = tpu.memref_slice %arg6[%c0_i32_40, %c3_i32, %c0_i32_75] : memref<2x8x128xf32, #tpu.memory_space<vmem>> -> memref<1x1x128xf32, #tpu.memory_space<vmem>>
        %84 = tpu.memref_squeeze %83 : memref<1x1x128xf32, #tpu.memory_space<vmem>> -> memref<1x128xf32, #tpu.memory_space<vmem>>
        %85 = tpu.memref_slice %arg7[%c0_i32_14] : memref<2x!tpu.dma_semaphore, #tpu.memory_space<semaphore_mem>> -> memref<1x!tpu.dma_semaphore, #tpu.memory_space<semaphore_mem>>
        %86 = tpu.memref_squeeze %85 : memref<1x!tpu.dma_semaphore, #tpu.memory_space<semaphore_mem>> -> memref<!tpu.dma_semaphore, #tpu.memory_space<semaphore_mem>>
        tpu.enqueue_dma source(%82 : memref<1x128xf32, #tpu.memory_space<any>>) target(%84 : memref<1x128xf32, #tpu.memory_space<vmem>>) target_semaphore(%86 : memref<!tpu.dma_semaphore, #tpu.memory_space<semaphore_mem>>)
      } else {
      }
      %c4_i32_42 = arith.constant 4 : i32
      %51 = arith.cmpi sge, %47, %c4_i32_42 : i32
      %52 = arith.extui %51 : i1 to i32
      %c0_i32_43 = arith.constant 0 : i32
      %c0_i32_44 = arith.constant 0 : i32
      %53 = arith.cmpi ne, %52, %c0_i32_44 : i32
      scf.if %53 {
        %c7_i32_74 = arith.constant 7 : i32
        %82 = arith.minsi %47, %c7_i32_74 : i32
        %c8_i32_75 = arith.constant 8 : i32
        %83 = arith.muli %arg0, %c8_i32_75 : i32
        %84 = arith.addi %83, %82 : i32
        %85 = arith.index_cast %84 : i32 to index
        %86 = memref.load %arg2[%85] : memref<16xi32, #tpu.memory_space<smem>>
        %c0_i32_76 = arith.constant 0 : i32
        %c63_i32 = arith.constant 63 : i32
        %87 = arith.maxsi %c0_i32_76, %86 : i32
        %88 = arith.minsi %c63_i32, %87 : i32
        %c0_i32_77 = arith.constant 0 : i32
        %89 = tpu.memref_slice %arg3[%88, %c0_i32_77] : memref<64x128xf32, #tpu.memory_space<any>> -> memref<1x128xf32, #tpu.memory_space<any>>
        %c0_i32_78 = arith.constant 0 : i32
        %90 = tpu.memref_slice %arg6[%c0_i32_43, %c3_i32, %c0_i32_78] : memref<2x8x128xf32, #tpu.memory_space<vmem>> -> memref<1x1x128xf32, #tpu.memory_space<vmem>>
        %91 = tpu.memref_squeeze %90 : memref<1x1x128xf32, #tpu.memory_space<vmem>> -> memref<1x128xf32, #tpu.memory_space<vmem>>
        %92 = tpu.memref_slice %arg7[%c0_i32_14] : memref<2x!tpu.dma_semaphore, #tpu.memory_space<semaphore_mem>> -> memref<1x!tpu.dma_semaphore, #tpu.memory_space<semaphore_mem>>
        %93 = tpu.memref_squeeze %92 : memref<1x!tpu.dma_semaphore, #tpu.memory_space<semaphore_mem>> -> memref<!tpu.dma_semaphore, #tpu.memory_space<semaphore_mem>>
        tpu.enqueue_dma source(%89 : memref<1x128xf32, #tpu.memory_space<any>>) target(%91 : memref<1x128xf32, #tpu.memory_space<vmem>>) target_semaphore(%93 : memref<!tpu.dma_semaphore, #tpu.memory_space<semaphore_mem>>)
      } else {
      }
      %c4_i32_45 = arith.constant 4 : i32
      %c0_i32_46 = arith.constant 0 : i32
      %54 = arith.addi %c0_i32_46, %c4_i32_45 : i32
      %c4_i32_47 = arith.constant 4 : i32
      %55 = arith.cmpi slt, %54, %c4_i32_47 : i32
      %56 = arith.extui %55 : i1 to i32
      %c0_i32_48 = arith.constant 0 : i32
      %c0_i32_49 = arith.constant 0 : i32
      %57 = arith.cmpi ne, %56, %c0_i32_49 : i32
      scf.if %57 {
        %c0_i32_74 = arith.constant 0 : i32
        %82 = tpu.memref_slice %arg4[%54, %c0_i32_74] : memref<4x128xf32, #tpu.memory_space<any>> -> memref<1x128xf32, #tpu.memory_space<any>>
        %c0_i32_75 = arith.constant 0 : i32
        %83 = tpu.memref_slice %arg6[%c0_i32_48, %c4_i32_45, %c0_i32_75] : memref<2x8x128xf32, #tpu.memory_space<vmem>> -> memref<1x1x128xf32, #tpu.memory_space<vmem>>
        %84 = tpu.memref_squeeze %83 : memref<1x1x128xf32, #tpu.memory_space<vmem>> -> memref<1x128xf32, #tpu.memory_space<vmem>>
        %85 = tpu.memref_slice %arg7[%c0_i32_14] : memref<2x!tpu.dma_semaphore, #tpu.memory_space<semaphore_mem>> -> memref<1x!tpu.dma_semaphore, #tpu.memory_space<semaphore_mem>>
        %86 = tpu.memref_squeeze %85 : memref<1x!tpu.dma_semaphore, #tpu.memory_space<semaphore_mem>> -> memref<!tpu.dma_semaphore, #tpu.memory_space<semaphore_mem>>
        tpu.enqueue_dma source(%82 : memref<1x128xf32, #tpu.memory_space<any>>) target(%84 : memref<1x128xf32, #tpu.memory_space<vmem>>) target_semaphore(%86 : memref<!tpu.dma_semaphore, #tpu.memory_space<semaphore_mem>>)
      } else {
      }
      %c4_i32_50 = arith.constant 4 : i32
      %58 = arith.cmpi sge, %54, %c4_i32_50 : i32
      %59 = arith.extui %58 : i1 to i32
      %c0_i32_51 = arith.constant 0 : i32
      %c0_i32_52 = arith.constant 0 : i32
      %60 = arith.cmpi ne, %59, %c0_i32_52 : i32
      scf.if %60 {
        %c7_i32_74 = arith.constant 7 : i32
        %82 = arith.minsi %54, %c7_i32_74 : i32
        %c8_i32_75 = arith.constant 8 : i32
        %83 = arith.muli %arg0, %c8_i32_75 : i32
        %84 = arith.addi %83, %82 : i32
        %85 = arith.index_cast %84 : i32 to index
        %86 = memref.load %arg2[%85] : memref<16xi32, #tpu.memory_space<smem>>
        %c0_i32_76 = arith.constant 0 : i32
        %c63_i32 = arith.constant 63 : i32
        %87 = arith.maxsi %c0_i32_76, %86 : i32
        %88 = arith.minsi %c63_i32, %87 : i32
        %c0_i32_77 = arith.constant 0 : i32
        %89 = tpu.memref_slice %arg3[%88, %c0_i32_77] : memref<64x128xf32, #tpu.memory_space<any>> -> memref<1x128xf32, #tpu.memory_space<any>>
        %c0_i32_78 = arith.constant 0 : i32
        %90 = tpu.memref_slice %arg6[%c0_i32_51, %c4_i32_45, %c0_i32_78] : memref<2x8x128xf32, #tpu.memory_space<vmem>> -> memref<1x1x128xf32, #tpu.memory_space<vmem>>
        %91 = tpu.memref_squeeze %90 : memref<1x1x128xf32, #tpu.memory_space<vmem>> -> memref<1x128xf32, #tpu.memory_space<vmem>>
        %92 = tpu.memref_slice %arg7[%c0_i32_14] : memref<2x!tpu.dma_semaphore, #tpu.memory_space<semaphore_mem>> -> memref<1x!tpu.dma_semaphore, #tpu.memory_space<semaphore_mem>>
        %93 = tpu.memref_squeeze %92 : memref<1x!tpu.dma_semaphore, #tpu.memory_space<semaphore_mem>> -> memref<!tpu.dma_semaphore, #tpu.memory_space<semaphore_mem>>
        tpu.enqueue_dma source(%89 : memref<1x128xf32, #tpu.memory_space<any>>) target(%91 : memref<1x128xf32, #tpu.memory_space<vmem>>) target_semaphore(%93 : memref<!tpu.dma_semaphore, #tpu.memory_space<semaphore_mem>>)
      } else {
      }
      %c5_i32 = arith.constant 5 : i32
      %c0_i32_53 = arith.constant 0 : i32
      %61 = arith.addi %c0_i32_53, %c5_i32 : i32
      %c4_i32_54 = arith.constant 4 : i32
      %62 = arith.cmpi slt, %61, %c4_i32_54 : i32
      %63 = arith.extui %62 : i1 to i32
      %c0_i32_55 = arith.constant 0 : i32
      %c0_i32_56 = arith.constant 0 : i32
      %64 = arith.cmpi ne, %63, %c0_i32_56 : i32
      scf.if %64 {
        %c0_i32_74 = arith.constant 0 : i32
        %82 = tpu.memref_slice %arg4[%61, %c0_i32_74] : memref<4x128xf32, #tpu.memory_space<any>> -> memref<1x128xf32, #tpu.memory_space<any>>
        %c0_i32_75 = arith.constant 0 : i32
        %83 = tpu.memref_slice %arg6[%c0_i32_55, %c5_i32, %c0_i32_75] : memref<2x8x128xf32, #tpu.memory_space<vmem>> -> memref<1x1x128xf32, #tpu.memory_space<vmem>>
        %84 = tpu.memref_squeeze %83 : memref<1x1x128xf32, #tpu.memory_space<vmem>> -> memref<1x128xf32, #tpu.memory_space<vmem>>
        %85 = tpu.memref_slice %arg7[%c0_i32_14] : memref<2x!tpu.dma_semaphore, #tpu.memory_space<semaphore_mem>> -> memref<1x!tpu.dma_semaphore, #tpu.memory_space<semaphore_mem>>
        %86 = tpu.memref_squeeze %85 : memref<1x!tpu.dma_semaphore, #tpu.memory_space<semaphore_mem>> -> memref<!tpu.dma_semaphore, #tpu.memory_space<semaphore_mem>>
        tpu.enqueue_dma source(%82 : memref<1x128xf32, #tpu.memory_space<any>>) target(%84 : memref<1x128xf32, #tpu.memory_space<vmem>>) target_semaphore(%86 : memref<!tpu.dma_semaphore, #tpu.memory_space<semaphore_mem>>)
      } else {
      }
      %c4_i32_57 = arith.constant 4 : i32
      %65 = arith.cmpi sge, %61, %c4_i32_57 : i32
      %66 = arith.extui %65 : i1 to i32
      %c0_i32_58 = arith.constant 0 : i32
      %c0_i32_59 = arith.constant 0 : i32
      %67 = arith.cmpi ne, %66, %c0_i32_59 : i32
      scf.if %67 {
        %c7_i32_74 = arith.constant 7 : i32
        %82 = arith.minsi %61, %c7_i32_74 : i32
        %c8_i32_75 = arith.constant 8 : i32
        %83 = arith.muli %arg0, %c8_i32_75 : i32
        %84 = arith.addi %83, %82 : i32
        %85 = arith.index_cast %84 : i32 to index
        %86 = memref.load %arg2[%85] : memref<16xi32, #tpu.memory_space<smem>>
        %c0_i32_76 = arith.constant 0 : i32
        %c63_i32 = arith.constant 63 : i32
        %87 = arith.maxsi %c0_i32_76, %86 : i32
        %88 = arith.minsi %c63_i32, %87 : i32
        %c0_i32_77 = arith.constant 0 : i32
        %89 = tpu.memref_slice %arg3[%88, %c0_i32_77] : memref<64x128xf32, #tpu.memory_space<any>> -> memref<1x128xf32, #tpu.memory_space<any>>
        %c0_i32_78 = arith.constant 0 : i32
        %90 = tpu.memref_slice %arg6[%c0_i32_58, %c5_i32, %c0_i32_78] : memref<2x8x128xf32, #tpu.memory_space<vmem>> -> memref<1x1x128xf32, #tpu.memory_space<vmem>>
        %91 = tpu.memref_squeeze %90 : memref<1x1x128xf32, #tpu.memory_space<vmem>> -> memref<1x128xf32, #tpu.memory_space<vmem>>
        %92 = tpu.memref_slice %arg7[%c0_i32_14] : memref<2x!tpu.dma_semaphore, #tpu.memory_space<semaphore_mem>> -> memref<1x!tpu.dma_semaphore, #tpu.memory_space<semaphore_mem>>
        %93 = tpu.memref_squeeze %92 : memref<1x!tpu.dma_semaphore, #tpu.memory_space<semaphore_mem>> -> memref<!tpu.dma_semaphore, #tpu.memory_space<semaphore_mem>>
        tpu.enqueue_dma source(%89 : memref<1x128xf32, #tpu.memory_space<any>>) target(%91 : memref<1x128xf32, #tpu.memory_space<vmem>>) target_semaphore(%93 : memref<!tpu.dma_semaphore, #tpu.memory_space<semaphore_mem>>)
      } else {
      }
      %c6_i32 = arith.constant 6 : i32
      %c0_i32_60 = arith.constant 0 : i32
      %68 = arith.addi %c0_i32_60, %c6_i32 : i32
      %c4_i32_61 = arith.constant 4 : i32
      %69 = arith.cmpi slt, %68, %c4_i32_61 : i32
      %70 = arith.extui %69 : i1 to i32
      %c0_i32_62 = arith.constant 0 : i32
      %c0_i32_63 = arith.constant 0 : i32
      %71 = arith.cmpi ne, %70, %c0_i32_63 : i32
      scf.if %71 {
        %c0_i32_74 = arith.constant 0 : i32
        %82 = tpu.memref_slice %arg4[%68, %c0_i32_74] : memref<4x128xf32, #tpu.memory_space<any>> -> memref<1x128xf32, #tpu.memory_space<any>>
        %c0_i32_75 = arith.constant 0 : i32
        %83 = tpu.memref_slice %arg6[%c0_i32_62, %c6_i32, %c0_i32_75] : memref<2x8x128xf32, #tpu.memory_space<vmem>> -> memref<1x1x128xf32, #tpu.memory_space<vmem>>
        %84 = tpu.memref_squeeze %83 : memref<1x1x128xf32, #tpu.memory_space<vmem>> -> memref<1x128xf32, #tpu.memory_space<vmem>>
        %85 = tpu.memref_slice %arg7[%c0_i32_14] : memref<2x!tpu.dma_semaphore, #tpu.memory_space<semaphore_mem>> -> memref<1x!tpu.dma_semaphore, #tpu.memory_space<semaphore_mem>>
        %86 = tpu.memref_squeeze %85 : memref<1x!tpu.dma_semaphore, #tpu.memory_space<semaphore_mem>> -> memref<!tpu.dma_semaphore, #tpu.memory_space<semaphore_mem>>
        tpu.enqueue_dma source(%82 : memref<1x128xf32, #tpu.memory_space<any>>) target(%84 : memref<1x128xf32, #tpu.memory_space<vmem>>) target_semaphore(%86 : memref<!tpu.dma_semaphore, #tpu.memory_space<semaphore_mem>>)
      } else {
      }
      %c4_i32_64 = arith.constant 4 : i32
      %72 = arith.cmpi sge, %68, %c4_i32_64 : i32
      %73 = arith.extui %72 : i1 to i32
      %c0_i32_65 = arith.constant 0 : i32
      %c0_i32_66 = arith.constant 0 : i32
      %74 = arith.cmpi ne, %73, %c0_i32_66 : i32
      scf.if %74 {
        %c7_i32_74 = arith.constant 7 : i32
        %82 = arith.minsi %68, %c7_i32_74 : i32
        %c8_i32_75 = arith.constant 8 : i32
        %83 = arith.muli %arg0, %c8_i32_75 : i32
        %84 = arith.addi %83, %82 : i32
        %85 = arith.index_cast %84 : i32 to index
        %86 = memref.load %arg2[%85] : memref<16xi32, #tpu.memory_space<smem>>
        %c0_i32_76 = arith.constant 0 : i32
        %c63_i32 = arith.constant 63 : i32
        %87 = arith.maxsi %c0_i32_76, %86 : i32
        %88 = arith.minsi %c63_i32, %87 : i32
        %c0_i32_77 = arith.constant 0 : i32
        %89 = tpu.memref_slice %arg3[%88, %c0_i32_77] : memref<64x128xf32, #tpu.memory_space<any>> -> memref<1x128xf32, #tpu.memory_space<any>>
        %c0_i32_78 = arith.constant 0 : i32
        %90 = tpu.memref_slice %arg6[%c0_i32_65, %c6_i32, %c0_i32_78] : memref<2x8x128xf32, #tpu.memory_space<vmem>> -> memref<1x1x128xf32, #tpu.memory_space<vmem>>
        %91 = tpu.memref_squeeze %90 : memref<1x1x128xf32, #tpu.memory_space<vmem>> -> memref<1x128xf32, #tpu.memory_space<vmem>>
        %92 = tpu.memref_slice %arg7[%c0_i32_14] : memref<2x!tpu.dma_semaphore, #tpu.memory_space<semaphore_mem>> -> memref<1x!tpu.dma_semaphore, #tpu.memory_space<semaphore_mem>>
        %93 = tpu.memref_squeeze %92 : memref<1x!tpu.dma_semaphore, #tpu.memory_space<semaphore_mem>> -> memref<!tpu.dma_semaphore, #tpu.memory_space<semaphore_mem>>
        tpu.enqueue_dma source(%89 : memref<1x128xf32, #tpu.memory_space<any>>) target(%91 : memref<1x128xf32, #tpu.memory_space<vmem>>) target_semaphore(%93 : memref<!tpu.dma_semaphore, #tpu.memory_space<semaphore_mem>>)
      } else {
      }
      %c7_i32 = arith.constant 7 : i32
      %c0_i32_67 = arith.constant 0 : i32
      %75 = arith.addi %c0_i32_67, %c7_i32 : i32
      %c4_i32_68 = arith.constant 4 : i32
      %76 = arith.cmpi slt, %75, %c4_i32_68 : i32
      %77 = arith.extui %76 : i1 to i32
      %c0_i32_69 = arith.constant 0 : i32
      %c0_i32_70 = arith.constant 0 : i32
      %78 = arith.cmpi ne, %77, %c0_i32_70 : i32
      scf.if %78 {
        %c0_i32_74 = arith.constant 0 : i32
        %82 = tpu.memref_slice %arg4[%75, %c0_i32_74] : memref<4x128xf32, #tpu.memory_space<any>> -> memref<1x128xf32, #tpu.memory_space<any>>
        %c0_i32_75 = arith.constant 0 : i32
        %83 = tpu.memref_slice %arg6[%c0_i32_69, %c7_i32, %c0_i32_75] : memref<2x8x128xf32, #tpu.memory_space<vmem>> -> memref<1x1x128xf32, #tpu.memory_space<vmem>>
        %84 = tpu.memref_squeeze %83 : memref<1x1x128xf32, #tpu.memory_space<vmem>> -> memref<1x128xf32, #tpu.memory_space<vmem>>
        %85 = tpu.memref_slice %arg7[%c0_i32_14] : memref<2x!tpu.dma_semaphore, #tpu.memory_space<semaphore_mem>> -> memref<1x!tpu.dma_semaphore, #tpu.memory_space<semaphore_mem>>
        %86 = tpu.memref_squeeze %85 : memref<1x!tpu.dma_semaphore, #tpu.memory_space<semaphore_mem>> -> memref<!tpu.dma_semaphore, #tpu.memory_space<semaphore_mem>>
        tpu.enqueue_dma source(%82 : memref<1x128xf32, #tpu.memory_space<any>>) target(%84 : memref<1x128xf32, #tpu.memory_space<vmem>>) target_semaphore(%86 : memref<!tpu.dma_semaphore, #tpu.memory_space<semaphore_mem>>)
      } else {
      }
      %c4_i32_71 = arith.constant 4 : i32
      %79 = arith.cmpi sge, %75, %c4_i32_71 : i32
      %80 = arith.extui %79 : i1 to i32
      %c0_i32_72 = arith.constant 0 : i32
      %c0_i32_73 = arith.constant 0 : i32
      %81 = arith.cmpi ne, %80, %c0_i32_73 : i32
      scf.if %81 {
        %c7_i32_74 = arith.constant 7 : i32
        %82 = arith.minsi %75, %c7_i32_74 : i32
        %c8_i32_75 = arith.constant 8 : i32
        %83 = arith.muli %arg0, %c8_i32_75 : i32
        %84 = arith.addi %83, %82 : i32
        %85 = arith.index_cast %84 : i32 to index
        %86 = memref.load %arg2[%85] : memref<16xi32, #tpu.memory_space<smem>>
        %c0_i32_76 = arith.constant 0 : i32
        %c63_i32 = arith.constant 63 : i32
        %87 = arith.maxsi %c0_i32_76, %86 : i32
        %88 = arith.minsi %c63_i32, %87 : i32
        %c0_i32_77 = arith.constant 0 : i32
        %89 = tpu.memref_slice %arg3[%88, %c0_i32_77] : memref<64x128xf32, #tpu.memory_space<any>> -> memref<1x128xf32, #tpu.memory_space<any>>
        %c0_i32_78 = arith.constant 0 : i32
        %90 = tpu.memref_slice %arg6[%c0_i32_72, %c7_i32, %c0_i32_78] : memref<2x8x128xf32, #tpu.memory_space<vmem>> -> memref<1x1x128xf32, #tpu.memory_space<vmem>>
        %91 = tpu.memref_squeeze %90 : memref<1x1x128xf32, #tpu.memory_space<vmem>> -> memref<1x128xf32, #tpu.memory_space<vmem>>
        %92 = tpu.memref_slice %arg7[%c0_i32_14] : memref<2x!tpu.dma_semaphore, #tpu.memory_space<semaphore_mem>> -> memref<1x!tpu.dma_semaphore, #tpu.memory_space<semaphore_mem>>
        %93 = tpu.memref_squeeze %92 : memref<1x!tpu.dma_semaphore, #tpu.memory_space<semaphore_mem>> -> memref<!tpu.dma_semaphore, #tpu.memory_space<semaphore_mem>>
        tpu.enqueue_dma source(%89 : memref<1x128xf32, #tpu.memory_space<any>>) target(%91 : memref<1x128xf32, #tpu.memory_space<vmem>>) target_semaphore(%93 : memref<!tpu.dma_semaphore, #tpu.memory_space<semaphore_mem>>)
      } else {
      }
      %c8_i32 = arith.constant 8 : i32
    } else {
    }
    %c1_i32_5 = arith.constant 1 : i32
    %13 = arith.subi %c1_i32_5, %9 : i32
    %c0_i32_6 = arith.constant 0 : i32
    %c0_i32_7 = arith.constant 0 : i32
    %14 = tpu.memref_slice %arg6[%13, %c0_i32_6, %c0_i32_7] : memref<2x8x128xf32, #tpu.memory_space<vmem>> -> memref<1x8x128xf32, #tpu.memory_space<vmem>>
    %15 = tpu.memref_squeeze %14 : memref<1x8x128xf32, #tpu.memory_space<vmem>> -> memref<8x128xf32, #tpu.memory_space<vmem>>
    %c0_i32_8 = arith.constant 0 : i32
    %c0_i32_9 = arith.constant 0 : i32
    %16 = tpu.memref_slice %arg6[%9, %c0_i32_8, %c0_i32_9] : memref<2x8x128xf32, #tpu.memory_space<vmem>> -> memref<1x8x128xf32, #tpu.memory_space<vmem>>
    %17 = tpu.memref_squeeze %16 : memref<1x8x128xf32, #tpu.memory_space<vmem>> -> memref<8x128xf32, #tpu.memory_space<vmem>>
    %18 = tpu.memref_slice %arg7[%9] : memref<2x!tpu.dma_semaphore, #tpu.memory_space<semaphore_mem>> -> memref<1x!tpu.dma_semaphore, #tpu.memory_space<semaphore_mem>>
    %19 = tpu.memref_squeeze %18 : memref<1x!tpu.dma_semaphore, #tpu.memory_space<semaphore_mem>> -> memref<!tpu.dma_semaphore, #tpu.memory_space<semaphore_mem>>
    tpu.wait_dma2 semaphore(%19 : memref<!tpu.dma_semaphore, #tpu.memory_space<semaphore_mem>>) src(%15 : memref<8x128xf32, #tpu.memory_space<vmem>>) dst(%17 : memref<8x128xf32, #tpu.memory_space<vmem>>)
    %20 = arith.index_cast %9 : i32 to index
    %c0 = arith.constant 0 : index
    %c0_10 = arith.constant 0 : index
    %21 = vector.load %arg6[%20, %c0, %c0_10] : memref<2x8x128xf32, #tpu.memory_space<vmem>>, vector<1x8x128xf32>
    %22 = vector.shape_cast %21 : vector<1x8x128xf32> to vector<8x128xf32>
    %c0_11 = arith.constant 0 : index
    %c0_12 = arith.constant 0 : index
    %c0_13 = arith.constant 0 : index
    %23 = vector.load %arg5[%c0_11, %c0_12, %c0_13] : memref<1x8x128xf32, #tpu.memory_space<vmem>>, vector<1x8x128xf32>
    %24 = vector.shape_cast %23 : vector<1x8x128xf32> to vector<8x128xf32>
    %25 = vector.shape_cast %22 : vector<8x128xf32> to vector<1x8x128xf32>
    tpu.vector_store %arg5[%c0_11, %c0_12, %c0_13], %25 {strides = array<i32>} : memref<1x8x128xf32, #tpu.memory_space<vmem>>, vector<1x8x128xf32>,
    return
  }
  func.func @transform_2(%arg0: i32, %arg1: i32, %arg2: memref<16xi32, #tpu.memory_space<smem>>) -> (i32, i32, i32) {
    %c0_i32 = arith.constant 0 : i32
    %c0_i32_0 = arith.constant 0 : i32
    return %arg0, %arg1, %c0_i32 : i32, i32, i32
  }
}

</mosaic_0001>

<bundles_post_ra>
// kernel: tpu_custom_call.1
= control target key start
LH: loop header
LB: loop body
LE: loop exit
PB: predicated region body
PF: predicated region fallthrough
CT: control target
= control target key end

     0   :  { %s679_s15 = smov [#allocation5]   ;;  %s868_s0 = inlined_call_operand.hbm [shape: s32[16], index: 0, kind: input, shape index: {}]   ;;  %s869_s1 = inlined_call_operand.hbm [shape: f32[64,128], index: 1, kind: input, shape index: {}]   ;;  %s870_s2 = inlined_call_operand.hbm [shape: f32[4,128], index: 2, kind: input, shape index: {}]   ;;  %s871_s3 = inlined_call_operand.hbm [shape: f32[2,8,128], index: 3, kind: output, shape index: {}]  }
   0x1   :  { %s9_s14 = sshll.u32 %s868_s0, 4  ;;  %s10_s14 = int_to_ptr.hbm [resolvable:$true] %s9_s14 }
   0x2   :  { %12 = dma.hbm_to_smem %s10_s14, 16, %s679_s15, [#allocation4] }
   0x3   :  { %655 = dma.done.wait [#allocation4], 16 }
   0x4   :  { %656 = vsyncadd [#allocation4], 4294967280 }
   0x5   :  { %15 = sfence }
   0x6   :  { %16 = vsyncpa [#allocation7], 0 }
   0x7   :  { %18 = vsyncpa [#allocation7 + $0x1], 0  ;;  %s711_s16 = smov 0   ;;  %s713_s17 = smov 0  }
   0x8   :  { %s715_s18 = smov 0   ;;  %s717_s19 = smov 0  }
   0x9 LB: > { %s33_s0 = sadd.s32 1, %s673_s18  ;;  %s320_s20 = sadd.s32 4294967295, %s677_s19   ;;  %s677_s19 = sphi %s717_s19, %s24_s19   ;;  %s673_s18 = sphi %s715_s18, %s876_s18   ;;  %s669_s17 = sphi %s713_s17, %s875_s17   ;;  %s665_s16 = sphi %s711_s16, %s874_s16  }
   0xa   : > { %p35_p0 = scmp.ge.s32.totalorder %s33_s0, 2  ;;  %p51_p1 = scmp.ne.s32.totalorder %s669_s17, %s665_s16 }
   0xb   : > { %s42_s21 = sadd.s32 1, %s669_s17  ;;  %p52_p2 = scmp.eq.s32.totalorder %s320_s20, 1 }
   0xc   : > { %s878_s0 = smov (%p35_p0, %s33_s0), 0  ;;  %p46_p3 = scmp.eq.s32.totalorder %s677_s19, 1 }
   0xd   : > { %s37_s22 = ssub.s32 %s673_s18, %s878_s0  ;;  %p741_p6 = por %p52_p2, %p51_p1 }
   0xe   : > { %p40_p4 = scmp.eq.s32.totalorder %s37_s22, 0  ;;  %p321_p5 = scmp.ne.s32.totalorder %s37_s22, 0 }
   0xf   : > { %p322_p8 = scmp.ge.s32.totalorder %s677_s19, 2 }
  0x10   : > { %s746_s24 = scalar_select %p40_p4, %s669_s17, %s42_s21  }
  0x11   : > { %p748_p7 = por %p321_p5, %p46_p3  ;;  %61 = sbr.rel (%p322_p8) target bundleno = 102 (0x66), region = 12 }
  0x12   : > { %s66_s26 = sand.u32 (!%p322_p8), 1, %s669_s17   ;;  %s92_s29 = sshll.u32 (!%p322_p8), %s870_s2, 4  ;;  %s93_s29 = int_to_ptr.hbm [resolvable:$true] %s92_s29 }
  0x13   : > { %s759_s30 = sshll.u32 (!%p322_p8), %s66_s26, 3  ;;  %s680_s4 = smov (!%p322_p8), [#allocation2]  }
  0x14   : > { %s94_s5 = sshll.u32 (!%p322_p8), %s680_s4, 4  ;;  %s98_s8 = scalar_lea.hbm (!%p322_p8), %s870_s2, 1  ;;  %s95_s5 = int_to_ptr.vmem [resolvable:$true] %s94_s5 }
  0x15   : > { %s107_s9 = sshll.u32 (!%p322_p8), %s98_s8, 4  ;;  %s681_s10 = smov (!%p322_p8), [#allocation2 + $0x1]   ;;  %s108_s9 = int_to_ptr.hbm [resolvable:$true] %s107_s9 }
  0x16   : > { %97 = dma.hbm_to_vmem [thread:$0]  %s93_s29, 16, %s95_s5, [#allocation3] }
  0x17   : > { %s109_s11 = sshll.u32 %s681_s10, 4  ;;  %s113_s14 = scalar_lea.hbm %s870_s2, 2  ;;  %s110_s11 = int_to_ptr.vmem [resolvable:$true] %s109_s11 }
  0x18   : > { %s122_s15 = sshll.u32 %s113_s14, 4  ;;  %s682_s20 = smov [#allocation2 + $0x2]   ;;  %s123_s15 = int_to_ptr.hbm [resolvable:$true] %s122_s15 }
  0x19   : > { %112 = dma.hbm_to_vmem [thread:$0]  %s108_s9, 16, %s110_s11, [#allocation3] }
  0x1a   : > { %s124_s21 = sshll.u32 %s682_s20, 4  ;;  %s128_s28 = scalar_lea.hbm %s870_s2, 3  ;;  %s125_s21 = int_to_ptr.vmem [resolvable:$true] %s124_s21 }
  0x1b   : > { %s137_s29 = sshll.u32 %s128_s28, 4  ;;  %s683_s4 = smov [#allocation2 + $0x3]   ;;  %s138_s29 = int_to_ptr.hbm [resolvable:$true] %s137_s29 }
  0x1c   : > { %127 = dma.hbm_to_vmem [thread:$0]  %s123_s15, 16, %s125_s21, [#allocation3] }
  0x1d   : > { %s139_s5 = sshll.u32 %s683_s4, 4  ;;  %s771_s6 = sshll.u32 %s673_s18, 3  ;;  %s140_s5 = int_to_ptr.vmem [resolvable:$true] %s139_s5 }
  0x1e   : > { %s144_s7 = sadd.s32 4, %s771_s6  ;;  %s165_s9 = sadd.s32 5, %s771_s6 }
  0x1f   : > { %142 = dma.hbm_to_vmem [thread:$0]  %s138_s29, 16, %s140_s5, [#allocation3] }
  0x20   : > { %s145_s8 = sld [smem:[#allocation5 + %s144_s7]]  ;;  %s684_s10 = smov [#allocation2 + $0x4]  }
  0x21   : > { %s775_s11 = sshll.u32 %s684_s10, 4  ;;  %s777_s12 = sld [smem:[#allocation5 + %s165_s9]]  ;;  %s162_s11 = int_to_ptr.vmem [resolvable:$true] %s775_s11 }
  0x22   : > { %s186_s18 = sadd.s32 6, %s771_s6  ;;  %s685_s13 = smov [#allocation2 + $0x5]  }
  0x23   : > { %s780_s14 = sshll.u32 %s685_s13, 4  ;;  %s783_s15 = sld [smem:[#allocation5 + %s186_s18]]  ;;  %s183_s14 = int_to_ptr.vmem [resolvable:$true] %s780_s14 }
  0x24   : > { %s207_s20 = sadd.s32 7, %s771_s6  ;;  %s798_s10 = scalar_lea.hbm %s869_s1, 64 }
  0x26   : > { %p146_p9 = scmp.gt.s32.totalorder %s145_s8, 0  ;;  %p325_p10 = scmp.lt.s32.totalorder %s145_s8, 63 }
  0x27   : > { %p167_p11 = scmp.gt.s32.totalorder %s777_s12, 0  ;;  %p330_p12 = scmp.lt.s32.totalorder %s777_s12, 63 }
  0x28   : > { %s880_s8 = smov (!%p146_p9, %s145_s8), 0 }
  0x29   : > { %s882_s8 = smov (!%p325_p10, %s880_s8), 63  ;;  %p188_p13 = scmp.gt.s32.totalorder %s783_s15, 0 }
  0x2a   : > { %s168_s21 = scalar_select %p167_p11, %s777_s12, 0 }
  0x2b   : > { %s150_s28 = scalar_lea.hbm %s869_s1, %s882_s8  ;;  %p335_p0 = scmp.lt.s32.totalorder %s783_s15, 63 }
  0x2c   : > { %s159_s29 = sshll.u32 %s150_s28, 4  ;;  %s160_s29 = int_to_ptr.hbm [resolvable:$true] %s159_s29 }
  0x2d   : > { %s515_s4 = sshra.s32 %s160_s29, 4  ;;  %s516_s4 = int_to_ptr.hbm [resolvable:$true] %s515_s4 }
  0x2e   : > { %s517_s5 = scalar_lea.hbm %s516_s4, 1  ;;  %p520_p2 = scmp.lt.s32.totalorder %s516_s4, %s869_s1 }
  0x2f   : > { %p518_p1 = scmp.ne.s32.totalorder %s516_s4, %s517_s5  ;;  %p521_p3 = scmp.lt.s32.totalorder %s798_s10, %s517_s5 }
  0x31   : > { %p522_p4 = por %p521_p3, %p520_p2 }
  0x33   : > { %p523_p5 = pnand %p522_p4, %p518_p1 }
  0x35   : > { %526 = shalt.err (!%p523_p5)  }
  0x36   : > { %164 = dma.hbm_to_vmem [thread:$0]  %s160_s29, 16, %s162_s11, [#allocation3] }
  0x37   : > { %s884_s21 = smov (!%p330_p12, %s168_s21), 63  ;;  %s812_s7 = sld [smem:[#allocation5 + %s207_s20]] }
  0x38   : > { %s189_s8 = scalar_select %p188_p13, %s783_s15, 0 }
  0x39   : > { %s171_s28 = scalar_lea.hbm %s869_s1, %s884_s21  ;;  %s686_s5 = smov [#allocation2 + $0x6]  }
  0x3a   : > { %s180_s4 = sshll.u32 %s171_s28, 4  ;;  %s203_s9 = sshll.u32 %s686_s5, 4  ;;  %s181_s4 = int_to_ptr.hbm [resolvable:$true] %s180_s4  ;;  %s204_s9 = int_to_ptr.vmem [resolvable:$true] %s203_s9 }
  0x3b   : > { %s539_s18 = sshra.s32 %s181_s4, 4  ;;  %s540_s18 = int_to_ptr.hbm [resolvable:$true] %s539_s18 }
  0x3c   : > { %s541_s11 = scalar_lea.hbm %s540_s18, 1  ;;  %p544_p9 = scmp.lt.s32.totalorder %s540_s18, %s869_s1 }
  0x3d   : > { %p542_p8 = scmp.ne.s32.totalorder %s540_s18, %s541_s11  ;;  %p545_p10 = scmp.lt.s32.totalorder %s798_s10, %s541_s11 }
  0x3f   : > { %p546_p11 = por %p545_p10, %p544_p9 }
  0x41   : > { %p547_p12 = pnand %p546_p11, %p542_p8 }
  0x43   : > { %550 = shalt.err (!%p547_p12)  }
  0x44   : > { %185 = dma.hbm_to_vmem [thread:$0]  %s181_s4, 16, %s183_s14, [#allocation3] }
  0x45   : > { %s886_s8 = smov (!%p335_p0, %s189_s8), 63  ;;  %p209_p13 = scmp.gt.s32.totalorder %s812_s7, 0 }
  0x46   : > { %s192_s13 = scalar_lea.hbm %s869_s1, %s886_s8  ;;  %p340_p1 = scmp.lt.s32.totalorder %s812_s7, 63 }
  0x47   : > { %s201_s22 = sshll.u32 %s192_s13, 4  ;;  %s202_s22 = int_to_ptr.hbm [resolvable:$true] %s201_s22 }
  0x48   : > { %s563_s27 = sshra.s32 %s202_s22, 4  ;;  %s564_s27 = int_to_ptr.hbm [resolvable:$true] %s563_s27 }
  0x49   : > { %s565_s28 = scalar_lea.hbm %s564_s27, 1  ;;  %p568_p3 = scmp.lt.s32.totalorder %s564_s27, %s869_s1 }
  0x4a   : > { %p566_p2 = scmp.ne.s32.totalorder %s564_s27, %s565_s28  ;;  %p569_p4 = scmp.lt.s32.totalorder %s798_s10, %s565_s28 }
  0x4c   : > { %p570_p5 = por %p569_p4, %p568_p3 }
  0x4e   : > { %p571_p0 = pnand %p570_p5, %p566_p2 }
  0x50   : > { %574 = shalt.err (!%p571_p0)  }
  0x51   : > { %206 = dma.hbm_to_vmem [thread:$0]  %s202_s22, 16, %s204_s9, [#allocation3] }
  0x52   : > { %s210_s14 = scalar_select %p209_p13, %s812_s7, 0 }
  0x53   : > { %s687_s15 = smov [#allocation2 + $0x7]  }
  0x54   : > { %s224_s8 = sshll.u32 %s687_s15, 4  ;;  %s888_s14 = smov (!%p340_p1, %s210_s14), 63  ;;  %s225_s8 = int_to_ptr.vmem [resolvable:$true] %s224_s8 }
  0x55   : > { %s213_s12 = scalar_lea.hbm %s869_s1, %s888_s14 }
  0x56   : > { %s222_s29 = sshll.u32 %s213_s12, 4  ;;  %s223_s29 = int_to_ptr.hbm [resolvable:$true] %s222_s29 }
  0x57   : > { %s587_s20 = sshra.s32 %s223_s29, 4  ;;  %s588_s20 = int_to_ptr.hbm [resolvable:$true] %s587_s20 }
  0x58   : > { %s589_s9 = scalar_lea.hbm %s588_s20, 1  ;;  %p592_p9 = scmp.lt.s32.totalorder %s588_s20, %s869_s1 }
  0x59   : > { %p590_p8 = scmp.ne.s32.totalorder %s588_s20, %s589_s9  ;;  %p593_p10 = scmp.lt.s32.totalorder %s798_s10, %s589_s9 }
  0x5b   : > { %p594_p11 = por %p593_p10, %p592_p9 }
  0x5d   : > { %p595_p12 = pnand %p594_p11, %p590_p8 }
  0x5f   : > { %598 = shalt.err (!%p595_p12)  }
  0x60   : > { %227 = dma.hbm_to_vmem [thread:$0]  %s223_s29, 16, %s225_s8, [#allocation3] }
  0x61   : > { %s68_s7 = scalar_lea.vmem [#allocation6], %s759_s30 }
  0x62   : > { %657 = dma.done.wait [#allocation3], 128 }
  0x63   : > { %658 = vsyncadd [#allocation3], 4294967168  ;;  %s248_s28 = scalar_lea.hbm %s871_s3, %s771_s6  ;;  %s250_s5 = sshll.u32 %s68_s7, 4  ;;  %v234_v0 = vld [vmem:[#allocation2] sm:$0xff]  ;;  %s251_s5 = int_to_ptr.vmem [resolvable:$true] %s250_s5 }
  0x64   : > { %s252_s18 = sshll.u32 %s248_s28, 4  ;;  %235 = vst [vmem:[%s68_s7] sm:$0xff] %v234_v0  ;;  %s237_s10 = scalar_lea.sflag [#allocation7], %s66_s26  ;;  %s253_s18 = int_to_ptr.hbm [resolvable:$true] %s252_s18 }
  0x65   : > { %359 = dma.vmem_to_hbm [thread:$0]  (%p748_p7), %s251_s5, 128, %s253_s18, %s237_s10  }
  0x66 PF: > { %p365_p13 = scmp.ge.s32.totalorder %s677_s19, 1  ;;  %s264_s30 = sand.u32 1, %s665_s16  }
  0x67   : > { %s265_s6 = scalar_lea.sflag [#allocation7], %s264_s30 }
  0x68   : > { %p362_p1 = pnand %p365_p13, %p741_p6 }
  0x6a   : > { %p363_p2 = pneg %p362_p1 }
  0x6c   : > { %660 = dma.done.wait (%p363_p2), %s265_s6, 128  }
  0x6d   : > { %662 = vsyncadd (%p363_p2), %s265_s6, 4294967168  ;;  %s24_s19 = sadd.s32 1, %s677_s19   ;;  %s874_s16 = smov %s669_s17 }
  0x6e   : > { %p21_p3 = scmp.ge.s32.totalorder %s24_s19, 3   ;;  %s875_s17 = smov %s746_s24 }
  0x6f   : > { %s876_s18 = smov %s878_s0 }
  0x70   :  { %23 = sbr.rel (!%p21_p3) target bundleno = 9 (0x9), region = 97 }
  0x75   :  { %271 = vsyncpa [#allocation7], 1 }
  0x76   :  { %273 = vsyncpa [#allocation7 + $0x1], 1 }
  0x77   :  { %274 = vsyncmov [#allocation3] }
  0x7a   :  { %s275_s23 = vpop.sfrf %274 }
  0x7b   :  { %p349_p6 = scmp.ne.s32.totalorder %s275_s23, 0 }
  0x7d   :  { %279 = shalt.err (%p349_p6)  }
  0x7e   :  { %281 = vsyncmov [#allocation3 + $0x1] }
  0x81   :  { %s282_s25 = vpop.sfrf %281 }
  0x82   :  { %p350_p7 = scmp.ne.s32.totalorder %s282_s25, 0 }
  0x84   :  { %286 = shalt.err (%p350_p7)  }

</bundles_post_ra>
